<compile_context>
chip_gen: v7x
topology: tpu7x:2x2x1
jax: 0.10.0
libtpu: 0.0.40
codegen_flags: <defaults>
</compile_context>

<pallas_src>
import functools

import jax
import jax.numpy as jnp
from jax.experimental import pallas as pl
from jax.experimental.pallas import tpu as pltpu


# ------------------------------ small helpers ------------------------------ #

def _round_up(x, m):
    return ((x + m - 1) // m) * m


def _pad_to(x, rows, cols):
    pr, pc = rows - x.shape[0], cols - x.shape[1]
    if pr or pc:
        x = jnp.pad(x, ((0, pr), (0, pc)))
    return x


def _pick_tile(dim_padded, candidates=(512, 256, 128)):
    for c in candidates:
        if dim_padded % c == 0:
            return c
    return 128  # dim_padded is always a multiple of 128 here


# ----------------------------- GCN matmul kernel ---------------------------- #

def _make_gcn_mm_kernel(*, tk, epilogue, resident_rhs):
    """Tiled A@B with k-accumulation directly into the resident f32 output
    block, plus an optional fused epilogue at the last k step."""

    def _accumulate(a_ref, b_ref, o_ref):
        k = pl.program_id(1)

        @pl.when(k == 0)
        def _():
            o_ref[...] = jnp.zeros_like(o_ref)

        if resident_rhs:
            off = pl.multiple_of(k * tk, tk)
            b_blk = b_ref[pl.ds(off, tk), :]
        else:
            b_blk = b_ref[...]
        o_ref[...] += jnp.dot(a_ref[...], b_blk,
                              preferred_element_type=jnp.float32)

    if epilogue == "relu_w2":
        def kernel(a_ref, b_ref, w2_ref, o_ref):
            _accumulate(a_ref, b_ref, o_ref)

            @pl.when(pl.program_id(1) == pl.num_programs(1) - 1)
            def _():
                h1 = jnp.maximum(o_ref[...], 0.0)
                o_ref[...] = jnp.dot(h1, w2_ref[...],
                                     preferred_element_type=jnp.float32)
        return kernel

    if epilogue == "normalize":
        def kernel(a_ref, b_ref, o_ref):
            _accumulate(a_ref, b_ref, o_ref)

            @pl.when(pl.program_id(1) == pl.num_programs(1) - 1)
            def _():
                h = o_ref[...]
                ss = jnp.sum(h * h, axis=-1, keepdims=True)
                # max(||h||, 1e-8) == sqrt(max(ss, 1e-16)); rsqrt -> EUP slot.
                o_ref[...] = h * jax.lax.rsqrt(
                    jnp.maximum(ss, jnp.float32(1e-16)))
        return kernel

    def kernel(a_ref, b_ref, o_ref):
        _accumulate(a_ref, b_ref, o_ref)
    return kernel


def gcn_matmul(a, b, *, w2=None, epilogue="none"):
    """A @ B (+ fused epilogue).  All dims must already be 128-aligned."""
    mp, kp = a.shape
    kp2, n = b.shape
    assert kp == kp2, (a.shape, b.shape)
    assert mp % 128 == 0 and kp % 128 == 0 and n % 128 == 0

    tm = _pick_tile(mp)
    tk = _pick_tile(kp)

    # Keep the small RHS resident (DMA'd once) unless it would blow the VMEM
    # budget (v7x has only 64 MiB physical); otherwise stream it per-k.
    resident_rhs = (2 * kp * n * 4) <= (16 * 1024 * 1024)
    if resident_rhs:
        b_spec = pl.BlockSpec((kp, n), lambda i, k: (0, 0))
    else:
        b_spec = pl.BlockSpec((tk, n), lambda i, k: (k, 0))

    in_specs = [pl.BlockSpec((tm, tk), lambda i, k: (i, k)), b_spec]
    operands = [a, b]
    extra_flops = 0
    if epilogue == "relu_w2":
        assert w2 is not None and w2.shape == (n, n)
        in_specs.append(pl.BlockSpec((n, n), lambda i, k: (0, 0)))
        operands.append(w2)
        extra_flops = 2 * mp * n * n

    kernel = _make_gcn_mm_kernel(tk=tk, epilogue=epilogue,
                                 resident_rhs=resident_rhs)

    return pl.pallas_call(
        kernel,
        out_shape=jax.ShapeDtypeStruct((mp, n), jnp.float32),
        grid_spec=pltpu.PrefetchScalarGridSpec(
            num_scalar_prefetch=0,
            grid=(mp // tm, kp // tk),
            in_specs=in_specs,
            out_specs=pl.BlockSpec((tm, n), lambda i, k: (i, 0)),
        ),
        compiler_params=pltpu.CompilerParams(
            dimension_semantics=("parallel", "arbitrary"),
            vmem_limit_bytes=48 * 1024 * 1024,
        ),
        cost_estimate=pl.CostEstimate(
            flops=2 * mp * n * kp + extra_flops,
            transcendentals=0,
            bytes_accessed=4 * (mp * kp + kp * n + mp * n),
        ),
    )(*operands)


def run_gcn(adj, x, w1, w2):
    """2-layer GCN; returns row-normalized (unit-norm, eps-clamped) h[:N, :HID]."""
    n = adj.shape[0]
    f_in = x.shape[1]
    hid = w1.shape[1]
    n_p, f_p, h_p = _round_up(n, 128), _round_up(f_in, 128), _round_up(hid, 128)

    # Pad once; run the whole GCN in padded space; slice only the final h.
    adj_p = _pad_to(adj.astype(jnp.float32), n_p, n_p)
    x_p = _pad_to(x.astype(jnp.float32), n_p, f_p)
    w1_p = _pad_to(w1.astype(jnp.float32), f_p, h_p)
    w2_p = _pad_to(w2.astype(jnp.float32), h_p, h_p)

    xw1 = gcn_matmul(x_p, w1_p)                                   # X @ W1
    h1w2 = gcn_matmul(adj_p, xw1, w2=w2_p, epilogue="relu_w2")    # relu(A@XW1) @ W2
    h_norm = gcn_matmul(adj_p, h1w2, epilogue="normalize")        # unit rows of A@H1W2
    return h_norm[:n, :hid]


# ------------------------------ cosine kernel ------------------------------- #

_TE = 128  # edges per grid step


def _cosine_kernel(hs_ref, hd_ref, o_ref):
    # Rows are already unit-normalized (eps-clamped) per node, so cosine is a
    # plain row-reduce of the elementwise product.  Output is one lane-dense
    # (1, TE) block per grid step -> single unmasked store.
    cos = jnp.sum(hs_ref[...] * hd_ref[...], axis=-1)      # (TE,)
    o_ref[...] = ((cos + 1.0) * 0.5).reshape(1, -1)


def run_cosine(h_norm, srcs, drts):
    e = srcs.shape[0]
    if e == 0:
        return jnp.zeros((0,), jnp.float32)
    d = h_norm.shape[1]
    d_p = _round_up(d, 128)
    e_p = _round_up(e, _TE)

    hs = _pad_to(jnp.take(h_norm, srcs, axis=0).astype(jnp.float32), e_p, d_p)
    hd = _pad_to(jnp.take(h_norm, drts, axis=0).astype(jnp.float32), e_p, d_p)

    out = pl.pallas_call(
        _cosine_kernel,
        out_shape=jax.ShapeDtypeStruct((1, e_p), jnp.float32),
        grid=(e_p // _TE,),
        in_specs=[pl.BlockSpec((_TE, d_p), lambda i: (i, 0)),
                  pl.BlockSpec((_TE, d_p), lambda i: (i, 0))],
        out_specs=pl.BlockSpec((1, _TE), lambda i: (0, i)),
        compiler_params=pltpu.CompilerParams(
            dimension_semantics=("parallel",),   # per-block outputs -> 2-TC safe
        ),
    )(hs, hd)
    return out[0, :e]


def link_predictor_forward(x, adj, srcs, drts, w1, w2):
    h_norm = run_gcn(adj, x, w1, w2)
    return run_cosine(h_norm, srcs, drts)


# ------------------------------- reference ---------------------------------- #

def reference_forward(x, adj, srcs, drts, w1, w2):
    h1 = jnp.maximum(adj @ (x @ w1), 0.0)
    h = adj @ (h1 @ w2)
    a, b = h[srcs], h[drts]
    dot = jnp.sum(a * b, axis=-1)
    na = jnp.maximum(jnp.linalg.norm(a, axis=-1), 1e-8)
    nb = jnp.maximum(jnp.linalg.norm(b, axis=-1), 1e-8)
    return (dot / (na * nb) + 1.0) / 2.0


# --------------------------------- main -------------------------------------- #

if __name__ == "__main__":
    N = 256          # nodes
    F_IN = 128       # in_channels
    HID = 128        # hidden_channels
    E = 8            # number of (src, dst) query pairs

    key = jax.random.PRNGKey(0)
    k_x, k_a, k_w1, k_w2, k_s, k_d = jax.random.split(key, 6)

    x = jax.random.normal(k_x, (N, F_IN), dtype=jnp.float32)

    # deterministic random symmetric adjacency with self loops, sym-normalized
    raw = (jax.random.uniform(k_a, (N, N)) < 0.05).astype(jnp.float32)
    adj_bin = jnp.clip(raw + raw.T + jnp.eye(N, dtype=jnp.float32), 0.0, 1.0)
    deg = jnp.sum(adj_bin, axis=1)
    d_inv_sqrt = 1.0 / jnp.sqrt(deg)
    adj = adj_bin * d_inv_sqrt[:, None] * d_inv_sqrt[None, :]

    # deterministic GCN weights (glorot-ish scaled normals)
    w1 = jax.random.normal(k_w1, (F_IN, HID), dtype=jnp.float32) * (1.0 / jnp.sqrt(F_IN))
    w2 = jax.random.normal(k_w2, (HID, HID), dtype=jnp.float32) * (1.0 / jnp.sqrt(HID))

    srcs = jax.random.randint(k_s, (E,), 0, N, dtype=jnp.int32)
    drts = jax.random.randint(k_d, (E,), 0, N, dtype=jnp.int32)

    out = link_predictor_forward(x, adj, srcs, drts, w1, w2)
    out = jax.block_until_ready(out)

    ref = reference_forward(x, adj, srcs, drts, w1, w2)
    assert out.shape == (E,), out.shape
    assert jnp.allclose(out, ref, atol=1e-4, rtol=1e-4), (out, ref)

    print("KERNEL_OK")
</pallas_src>

<mosaic_0001>
module attributes {stable_mosaic.version = 11 : i64} {
  func.func @kernel(%arg0: i32, %arg1: i32, %arg2: memref<256x128xf32, #tpu.memory_space<vmem>>, %arg3: memref<128x128xf32, #tpu.memory_space<vmem>>, %arg4: memref<256x128xf32, #tpu.memory_space<vmem>>) attributes {dimension_semantics = [#tpu.dimension_semantics<parallel>, #tpu.dimension_semantics<arbitrary>], iteration_bounds = array<i64: 1, 1>, scalar_prefetch = 0 : i64, scratch_operands = 0 : i64, tpu.core_type = #tpu.core_type<tc>, window_params = [{transform_indices = @transform_0, window_bounds = array<i64: 256, 128>}, {pipeline_mode = #tpu.pipeline_mode<synchronous>, transform_indices = @transform_1, window_bounds = array<i64: 128, 128>}, {transform_indices = @transform_2, window_bounds = array<i64: 256, 128>}]} {
    %c0_i32 = arith.constant 0 : i32
    %0 = arith.cmpi eq, %arg1, %c0_i32 : i32
    %1 = arith.extui %0 : i1 to i32
    %c0_i32_0 = arith.constant 0 : i32
    %2 = arith.cmpi ne, %1, %c0_i32_0 : i32
    scf.if %2 {
      %cst_7 = arith.constant 0.000000e+00 : f32
      %12 = vector.broadcast %cst_7 : f32 to vector<256x128xf32>
      %c0_8 = arith.constant 0 : index
      %c0_9 = arith.constant 0 : index
      %13 = vector.load %arg4[%c0_8, %c0_9] : memref<256x128xf32, #tpu.memory_space<vmem>>, vector<256x128xf32>
      tpu.vector_store %arg4[%c0_8, %c0_9], %12 {strides = array<i32>} : memref<256x128xf32, #tpu.memory_space<vmem>>, vector<256x128xf32>,
    } else {
    }
    %c128_i32 = arith.constant 128 : i32
    %3 = arith.muli %arg1, %c128_i32 : i32
    %4 = tpu.assume_multiple %3, 128 : i32
    %5 = arith.index_cast %4 : i32 to index
    %c0 = arith.constant 0 : index
    %6 = vector.load %arg3[%5, %c0] : memref<128x128xf32, #tpu.memory_space<vmem>>, vector<128x128xf32>
    %c0_1 = arith.constant 0 : index
    %c0_2 = arith.constant 0 : index
    %7 = vector.load %arg4[%c0_1, %c0_2] : memref<256x128xf32, #tpu.memory_space<vmem>>, vector<256x128xf32>
    %c0_3 = arith.constant 0 : index
    %c0_4 = arith.constant 0 : index
    %8 = vector.load %arg2[%c0_3, %c0_4] : memref<256x128xf32, #tpu.memory_space<vmem>>, vector<256x128xf32>
    %cst = arith.constant dense<0.000000e+00> : vector<256x128xf32>
    %9 = tpu.matmul %8, %6, %cst {dimension_numbers = #tpu.dot_dimension_numbers<[1], [0], [0], [1], [0, 0, 1, 1], [], []>} : vector<256x128xf32>, vector<128x128xf32>, vector<256x128xf32> -> vector<256x128xf32>
    %10 = arith.addf %7, %9 : vector<256x128xf32>
    %c0_5 = arith.constant 0 : index
    %c0_6 = arith.constant 0 : index
    %11 = vector.load %arg4[%c0_5, %c0_6] : memref<256x128xf32, #tpu.memory_space<vmem>>, vector<256x128xf32>
    tpu.vector_store %arg4[%c0_5, %c0_6], %10 {strides = array<i32>} : memref<256x128xf32, #tpu.memory_space<vmem>>, vector<256x128xf32>,
    return
  }
  func.func @transform_0(%arg0: i32, %arg1: i32) -> (i32, i32) {
    %c0_i32 = arith.constant 0 : i32
    return %arg0, %arg1 : i32, i32
  }
  func.func @transform_1(%arg0: i32, %arg1: i32) -> (i32, i32) {
    %c0_i32 = arith.constant 0 : i32
    %c0_i32_0 = arith.constant 0 : i32
    %c0_i32_1 = arith.constant 0 : i32
    return %c0_i32, %c0_i32_0 : i32, i32
  }
  func.func @transform_2(%arg0: i32, %arg1: i32) -> (i32, i32) {
    %c0_i32 = arith.constant 0 : i32
    %c0_i32_0 = arith.constant 0 : i32
    return %arg0, %c0_i32 : i32, i32
  }
}

</mosaic_0001>

<bundles_post_ra>
// kernel: tpu_custom_call.1
= control target key start
LH: loop header
LB: loop body
LE: loop exit
PB: predicated region body
PF: predicated region fallthrough
CT: control target
= control target key end

     0   :  { %7 = vsyncpa [#allocation3], 0  ;;  %s784_s0 = inlined_call_operand.hbm [shape: f32[256,128], index: 0, kind: input, shape index: {}]   ;;  %s785_s1 = inlined_call_operand.hbm [shape: f32[128,128], index: 1, kind: input, shape index: {}]   ;;  %s786_s2 = inlined_call_operand.hbm [shape: f32[256,128], index: 2, kind: output, shape index: {}]  }
   0x1   :  { %8 = vsyncpa [#allocation6], 0 }
   0x2   :  { %9 = vsyncpa [#allocation4], 0  ;;  %s719_s9 = smov [#allocation2]   ;;  %s647_s13 = scalar_lea.hbm %s784_s0, 4096 }
   0x3   :  { %s15_s10 = sshll.u32 %s719_s9, 4  ;;  %p648_p0 = scmp.ne.s32.totalorder %s784_s0, %s647_s13  ;;  %s16_s10 = int_to_ptr.vmem [resolvable:$true] %s15_s10 }
   0x4   :  { %p651_p1 = scmp.lt.u32.totalorder %s647_s13, %s784_s0 }
   0x6   :  { %p653_p2 = pnand %p651_p1, %p648_p0 }
   0x8   :  { %656 = shalt.err (!%p653_p2)
}
   0x9   :  { %s657_s18 = scalar_lea.vmem %s16_s10, 4096  ;;  %p662_p4 = scmp.lt.s32.totalorder %s16_s10, %s16_s10 }
   0xa   :  { %p658_p3 = scmp.ne.s32.totalorder %s16_s10, %s657_s18  ;;  %p663_p5 = scmp.lt.s32.totalorder %s657_s18, %s657_s18 }
   0xc   :  { %p664_p6 = por %p663_p5, %p662_p4 }
   0xe   :  { %p665_p7 = pnand %p664_p6, %p658_p3 }
  0x10   :  { %668 = shalt.err (!%p665_p7)
}
  0x11   :  { %s720_s19 = smov 128   ;;  %s721_s20 = smov 8  }
  0x12   :  { %21 = dma.hbm_to_vmem [thread:$0]  %s784_s0, 4096, %s16_s10, [#allocation3], %s720_s19, %s720_s19, %s721_s20  }
  0x13   :  { %s722_s23 = smov [#allocation5]   ;;  %s669_s27 = scalar_lea.hbm %s785_s1, 2048 }
  0x14   :  { %s27_s24 = sshll.u32 %s722_s23, 4  ;;  %p670_p8 = scmp.ne.s32.totalorder %s785_s1, %s669_s27  ;;  %s28_s24 = int_to_ptr.vmem [resolvable:$true] %s27_s24 }
  0x15   :  { %p673_p9 = scmp.lt.u32.totalorder %s669_s27, %s785_s1 }
  0x17   :  { %p675_p10 = pnand %p673_p9, %p670_p8 }
  0x19   :  { %678 = shalt.err (!%p675_p10)
}
  0x1a   :  { %s679_s4 = scalar_lea.vmem %s28_s24, 2048  ;;  %p684_p12 = scmp.lt.s32.totalorder %s28_s24, %s28_s24 }
  0x1b   :  { %p680_p11 = scmp.ne.s32.totalorder %s28_s24, %s679_s4  ;;  %p685_p13 = scmp.lt.s32.totalorder %s679_s4, %s679_s4 }
  0x1d   :  { %p686_p0 = por %p685_p13, %p684_p12 }
  0x1f   :  { %p687_p1 = pnand %p686_p0, %p680_p11 }
  0x21   :  { %690 = shalt.err (!%p687_p1)
}
  0x22   :  { %33 = dma.hbm_to_vmem [thread:$0]  %s785_s1, 2048, %s28_s24, [#allocation6], %s720_s19, %s720_s19, %s721_s20  }
  0x23   :  { %713 = dma.done.wait [#allocation3], 4096  }
  0x24   :  { %714 = vsyncadd [#allocation3], 4294963200 }
  0x25   :  { %715 = dma.done.wait [#allocation6], 2048  }
  0x26   :  { %716 = vsyncadd [#allocation6], 4294965248  ;;  %v78_v0 = vld [vmem:[#allocation5] sm:$0xff]  ;;  %v79_v1 = vld [vmem:[#allocation5 + $0x8] sm:$0xff]  ;;  %s723_s1 = smov [#allocation7]  }
  0x27   :  { %v80_v2 = vld [vmem:[#allocation5 + $0x10] sm:$0xff]  ;;  %v593_v3 = vpack.c.bf16 %v79_v1, %v78_v0  ;;  %v81_v4 = vld [vmem:[#allocation5 + $0x18] sm:$0xff]  ;;  %v82_v6 = vld [vmem:[#allocation5 + $0x20] sm:$0xff]  ;;  %s452_s6 = sshll.u32 %s723_s1, 4  ;;  %s453_s6 = int_to_ptr.vmem [resolvable:$true] %s452_s6 }
  0x28   :  { %v597_v5 = vpack.c.bf16 %v81_v4, %v80_v2  ;;  %v83_v7 = vld [vmem:[#allocation5 + $0x28] sm:$0xff]  ;;  %v126_v9 = vld [vmem:[#allocation2] sm:$0xff]  ;;  %v84_v11 = vld [vmem:[#allocation5 + $0x30] sm:$0xff]  ;;  %s691_s7 = scalar_lea.vmem %s453_s6, 4096  ;;  %p696_p3 = scmp.lt.s32.totalorder %s453_s6, %s453_s6 }
  0x29   :  { %594 = vmatprep.subr.bf16.mxu0 %v593_v3  ;;  %625 = vmatprep.subr.bf16.mxu1 %v593_v3  ;;  %v601_v8 = vpack.c.bf16 %v83_v7, %v82_v6  ;;  %v142_v10 = vld [vmem:[#allocation2 + $0x80] sm:$0xff]  ;;  %v85_v12 = vld [vmem:[#allocation5 + $0x38] sm:$0xff]  ;;  %v87_v15 = vld [vmem:[#allocation5 + $0x48] sm:$0xff]  ;;  %p692_p2 = scmp.ne.s32.totalorder %s453_s6, %s691_s7  ;;  %p697_p4 = scmp.lt.s32.totalorder %s691_s7, %s691_s7 }
  0x2a   :  { %596 = vmatpush3.bf16.msra.mxu0 %v593_v3  ;;  %633 = vmatpush3.bf16.msra.mxu1 %v593_v3  ;;  %v605_v13 = vpack.c.bf16 %v85_v12, %v84_v11  ;;  %v86_v14 = vld [vmem:[#allocation5 + $0x40] sm:$0xff]  ;;  %v88_v17 = vld [vmem:[#allocation5 + $0x50] sm:$0xff]  ;;  %v89_v18 = vld [vmem:[#allocation5 + $0x58] sm:$0xff] }
  0x2b   :  { %598 = vmatprep.subr.bf16.mxu0 %v597_v5  ;;  %626 = vmatprep.subr.bf16.mxu1 %v597_v5  ;;  %v609_v16 = vpack.c.bf16 %v87_v15, %v86_v14  ;;  %v613_v19 = vpack.c.bf16 %v89_v18, %v88_v17  ;;  %v90_v20 = vld [vmem:[#allocation5 + $0x60] sm:$0xff]  ;;  %v91_v21 = vld [vmem:[#allocation5 + $0x68] sm:$0xff]  ;;  %v92_v23 = vld [vmem:[#allocation5 + $0x70] sm:$0xff]  ;;  %p698_p5 = por %p697_p4, %p696_p3 }
  0x2c   :  { %545 = vmatprep.mubr.f32.mxu0 %v126_v9  ;;  %569 = vmatprep.mubr.f32.mxu1 %v142_v10  ;;  %v617_v22 = vpack.c.bf16 %v91_v21, %v90_v20  ;;  %v93_v24 = vld [vmem:[#allocation5 + $0x78] sm:$0xff]  ;;  %v127_v26 = vld [vmem:[#allocation2 + $0x8] sm:$0xff]  ;;  %v128_v28 = vld [vmem:[#allocation2 + $0x10] sm:$0xff] }
  0x2d   :  { %v621_v25 = vpack.c.bf16 %v93_v24, %v92_v23  ;;  %v143_v27 = vld [vmem:[#allocation2 + $0x88] sm:$0xff]  ;;  %v144_v29 = vld [vmem:[#allocation2 + $0x90] sm:$0xff]  ;;  %v129_v30 = vld [vmem:[#allocation2 + $0x18] sm:$0xff]  ;;  %p699_p6 = pnand %p698_p5, %p692_p2 }
  0x2e   :  { %600 = vmatpush3.bf16.msra.mxu0 %v597_v5  ;;  %634 = vmatpush3.bf16.msra.mxu1 %v597_v5  ;;  %v145_v31 = vld [vmem:[#allocation2 + $0x98] sm:$0xff]  ;;  %v130_v32 = vld [vmem:[#allocation2 + $0x20] sm:$0xff]  ;;  %v131_v34 = vld [vmem:[#allocation2 + $0x28] sm:$0xff] }
  0x2f   :  { %602 = vmatprep.subr.bf16.mxu0 %v601_v8  ;;  %627 = vmatprep.subr.bf16.mxu1 %v601_v8  ;;  %v146_v33 = vld [vmem:[#allocation2 + $0xa0] sm:$0xff]  ;;  %v147_v35 = vld [vmem:[#allocation2 + $0xa8] sm:$0xff]  ;;  %v132_v36 = vld [vmem:[#allocation2 + $0x30] sm:$0xff] }
  0x30   :  { %v148_v37 = vld [vmem:[#allocation2 + $0xb0] sm:$0xff]  ;;  %v133_v38 = vld [vmem:[#allocation2 + $0x38] sm:$0xff]  ;;  %v134_v40 = vld [vmem:[#allocation2 + $0x40] sm:$0xff] }
  0x31   :  { %v149_v39 = vld [vmem:[#allocation2 + $0xb8] sm:$0xff]  ;;  %v150_v41 = vld [vmem:[#allocation2 + $0xc0] sm:$0xff]  ;;  %v135_v42 = vld [vmem:[#allocation2 + $0x48] sm:$0xff] }
  0x32   :  { %604 = vmatpush3.bf16.msra.mxu0 %v601_v8  ;;  %635 = vmatpush3.bf16.msra.mxu1 %v601_v8  ;;  %v151_v43 = vld [vmem:[#allocation2 + $0xc8] sm:$0xff]  ;;  %v136_v44 = vld [vmem:[#allocation2 + $0x50] sm:$0xff]  ;;  %v137_v46 = vld [vmem:[#allocation2 + $0x58] sm:$0xff] }
  0x33   :  { %606 = vmatprep.subr.bf16.mxu0 %v605_v13  ;;  %628 = vmatprep.subr.bf16.mxu1 %v605_v13  ;;  %v152_v45 = vld [vmem:[#allocation2 + $0xd0] sm:$0xff]  ;;  %v153_v47 = vld [vmem:[#allocation2 + $0xd8] sm:$0xff]  ;;  %v138_v48 = vld [vmem:[#allocation2 + $0x60] sm:$0xff] }
  0x34   :  { %v154_v49 = vld [vmem:[#allocation2 + $0xe0] sm:$0xff]  ;;  %v139_v50 = vld [vmem:[#allocation2 + $0x68] sm:$0xff]  ;;  %v140_v52 = vld [vmem:[#allocation2 + $0x70] sm:$0xff] }
  0x35   :  { %v155_v51 = vld [vmem:[#allocation2 + $0xe8] sm:$0xff]  ;;  %v156_v53 = vld [vmem:[#allocation2 + $0xf0] sm:$0xff]  ;;  %v141_v54 = vld [vmem:[#allocation2 + $0x78] sm:$0xff] }
  0x36   :  { %608 = vmatpush3.bf16.msra.mxu0 %v605_v13  ;;  %636 = vmatpush3.bf16.msra.mxu1 %v605_v13  ;;  %v157_v55 = vld [vmem:[#allocation2 + $0xf8] sm:$0xff] }
  0x37   :  { %610 = vmatprep.subr.bf16.mxu0 %v609_v16  ;;  %629 = vmatprep.subr.bf16.mxu1 %v609_v16 }
  0x3a   :  { %612 = vmatpush3.bf16.msra.mxu0 %v609_v16  ;;  %637 = vmatpush3.bf16.msra.mxu1 %v609_v16 }
  0x3b   :  { %614 = vmatprep.subr.bf16.mxu0 %v613_v19  ;;  %630 = vmatprep.subr.bf16.mxu1 %v613_v19 }
  0x3e   :  { %616 = vmatpush3.bf16.msra.mxu0 %v613_v19  ;;  %638 = vmatpush3.bf16.msra.mxu1 %v613_v19 }
  0x3f   :  { %618 = vmatprep.subr.bf16.mxu0 %v617_v22  ;;  %631 = vmatprep.subr.bf16.mxu1 %v617_v22 }
  0x42   :  { %620 = vmatpush3.bf16.msra.mxu0 %v617_v22  ;;  %639 = vmatpush3.bf16.msra.mxu1 %v617_v22 }
  0x43   :  { %622 = vmatprep.subr.bf16.mxu0 %v621_v25  ;;  %632 = vmatprep.subr.bf16.mxu1 %v621_v25 }
  0x46   :  { %624 = vmatpush3.bf16.msra.mxu0 %v621_v25  ;;  %640 = vmatpush3.bf16.msra.mxu1 %v621_v25 }
  0x49   :  { %546 = vmatmul.mubr.f32.vlgmr.msra.gmra.mrb[0].mxu0 %v127_v26  ;;  %570 = vmatmul.mubr.f32.vlgmr.msra.gmra.mrb[0].mxu1 %v143_v27 }
  0x4a   :  { %548 = vmatprep.mubr.f32.mxu0 %v128_v28  ;;  %572 = vmatprep.mubr.f32.mxu1 %v144_v29 }
  0x4d   :  { %549 = vmatmul.mubr.f32.gmra.mrb[2].mxu0 %v129_v30  ;;  %573 = vmatmul.mubr.f32.gmra.mrb[2].mxu1 %v145_v31 }
  0x4e   :  { %551 = vmatprep.mubr.f32.mxu0 %v130_v32  ;;  %575 = vmatprep.mubr.f32.mxu1 %v146_v33 }
  0x51   :  { %552 = vmatmul.mubr.f32.gmra.mrb[4].mxu0 %v131_v34  ;;  %576 = vmatmul.mubr.f32.gmra.mrb[4].mxu1 %v147_v35 }
  0x52   :  { %554 = vmatprep.mubr.f32.mxu0 %v132_v36  ;;  %578 = vmatprep.mubr.f32.mxu1 %v148_v37 }
  0x55   :  { %555 = vmatmul.mubr.f32.gmra.mrb[6].mxu0 %v133_v38  ;;  %579 = vmatmul.mubr.f32.gmra.mrb[6].mxu1 %v149_v39 }
  0x56   :  { %557 = vmatprep.mubr.f32.mxu0 %v134_v40  ;;  %581 = vmatprep.mubr.f32.mxu1 %v150_v41 }
  0x59   :  { %558 = vmatmul.mubr.f32.gmra.mrb[8].mxu0 %v135_v42  ;;  %582 = vmatmul.mubr.f32.gmra.mrb[8].mxu1 %v151_v43 }
  0x5a   :  { %560 = vmatprep.mubr.f32.mxu0 %v136_v44  ;;  %584 = vmatprep.mubr.f32.mxu1 %v152_v45 }
  0x5d   :  { %561 = vmatmul.mubr.f32.gmra.mrb[10].mxu0 %v137_v46  ;;  %585 = vmatmul.mubr.f32.gmra.mrb[10].mxu1 %v153_v47 }
  0x5e   :  { %563 = vmatprep.mubr.f32.mxu0 %v138_v48  ;;  %587 = vmatprep.mubr.f32.mxu1 %v154_v49 }
  0x61   :  { %564 = vmatmul.mubr.f32.gmra.mrb[12].mxu0 %v139_v50  ;;  %588 = vmatmul.mubr.f32.gmra.mrb[12].mxu1 %v155_v51 }
  0x62   :  { %566 = vmatprep.mubr.f32.mxu0 %v140_v52  ;;  %590 = vmatprep.mubr.f32.mxu1 %v156_v53 }
  0x65   :  { %567 = vmatmul.mubr.f32.gmra.mrb[14].mxu0 %v141_v54  ;;  %591 = vmatmul.mubr.f32.gmra.mrb[14].mxu1 %v157_v55 }
 0x11c   :  { %v547_v56 = vpop.f32.mrb[0].mxu0  ;;  %v571_v57 = vpop.f32.mrb[0].mxu1 }
 0x11d   :  { %v224_v58 = vpop.f32.mrb[1].mxu0  ;;  %v304_v59 = vpop.f32.mrb[1].mxu1  ;;  %416 = vst [vmem:[#allocation7 + $0x8] sm:$0xff] %v547_v56  ;;  %432 = vst [vmem:[#allocation7 + $0x88] sm:$0xff] %v571_v57 }
 0x11e   :  { %415 = vst [vmem:[#allocation7] sm:$0xff] %v224_v58  ;;  %431 = vst [vmem:[#allocation7 + $0x80] sm:$0xff] %v304_v59 }
 0x120   :  { %v550_v60 = vpop.f32.mrb[2].mxu0  ;;  %v574_v61 = vpop.f32.mrb[2].mxu1 }
 0x121   :  { %v234_v62 = vpop.f32.mrb[3].mxu0  ;;  %v314_v63 = vpop.f32.mrb[3].mxu1  ;;  %418 = vst [vmem:[#allocation7 + $0x18] sm:$0xff] %v550_v60  ;;  %434 = vst [vmem:[#allocation7 + $0x98] sm:$0xff] %v574_v61 }
 0x122   :  { %417 = vst [vmem:[#allocation7 + $0x10] sm:$0xff] %v234_v62  ;;  %433 = vst [vmem:[#allocation7 + $0x90] sm:$0xff] %v314_v63 }
 0x124   :  { %v553_v0 = vpop.f32.mrb[4].mxu0  ;;  %v577_v1 = vpop.f32.mrb[4].mxu1 }
 0x125   :  { %v244_v2 = vpop.f32.mrb[5].mxu0  ;;  %v324_v3 = vpop.f32.mrb[5].mxu1  ;;  %420 = vst [vmem:[#allocation7 + $0x28] sm:$0xff] %v553_v0  ;;  %436 = vst [vmem:[#allocation7 + $0xa8] sm:$0xff] %v577_v1 }
 0x126   :  { %419 = vst [vmem:[#allocation7 + $0x20] sm:$0xff] %v244_v2  ;;  %435 = vst [vmem:[#allocation7 + $0xa0] sm:$0xff] %v324_v3 }
 0x128   :  { %v556_v4 = vpop.f32.mrb[6].mxu0  ;;  %v580_v5 = vpop.f32.mrb[6].mxu1 }
 0x129   :  { %v254_v6 = vpop.f32.mrb[7].mxu0  ;;  %v334_v7 = vpop.f32.mrb[7].mxu1  ;;  %422 = vst [vmem:[#allocation7 + $0x38] sm:$0xff] %v556_v4  ;;  %438 = vst [vmem:[#allocation7 + $0xb8] sm:$0xff] %v580_v5 }
 0x12a   :  { %421 = vst [vmem:[#allocation7 + $0x30] sm:$0xff] %v254_v6  ;;  %437 = vst [vmem:[#allocation7 + $0xb0] sm:$0xff] %v334_v7 }
 0x12c   :  { %v559_v8 = vpop.f32.mrb[8].mxu0  ;;  %v583_v9 = vpop.f32.mrb[8].mxu1 }
 0x12d   :  { %v264_v10 = vpop.f32.mrb[9].mxu0  ;;  %v344_v11 = vpop.f32.mrb[9].mxu1  ;;  %424 = vst [vmem:[#allocation7 + $0x48] sm:$0xff] %v559_v8  ;;  %440 = vst [vmem:[#allocation7 + $0xc8] sm:$0xff] %v583_v9 }
 0x12e   :  { %423 = vst [vmem:[#allocation7 + $0x40] sm:$0xff] %v264_v10  ;;  %439 = vst [vmem:[#allocation7 + $0xc0] sm:$0xff] %v344_v11 }
 0x130   :  { %v562_v12 = vpop.f32.mrb[10].mxu0  ;;  %v586_v13 = vpop.f32.mrb[10].mxu1 }
 0x131   :  { %v274_v14 = vpop.f32.mrb[11].mxu0  ;;  %v354_v15 = vpop.f32.mrb[11].mxu1  ;;  %426 = vst [vmem:[#allocation7 + $0x58] sm:$0xff] %v562_v12  ;;  %442 = vst [vmem:[#allocation7 + $0xd8] sm:$0xff] %v586_v13 }
 0x132   :  { %425 = vst [vmem:[#allocation7 + $0x50] sm:$0xff] %v274_v14  ;;  %441 = vst [vmem:[#allocation7 + $0xd0] sm:$0xff] %v354_v15 }
 0x134   :  { %v565_v16 = vpop.f32.mrb[12].mxu0  ;;  %v589_v17 = vpop.f32.mrb[12].mxu1 }
 0x135   :  { %v284_v18 = vpop.f32.mrb[13].mxu0  ;;  %v364_v19 = vpop.f32.mrb[13].mxu1  ;;  %428 = vst [vmem:[#allocation7 + $0x68] sm:$0xff] %v565_v16  ;;  %444 = vst [vmem:[#allocation7 + $0xe8] sm:$0xff] %v589_v17 }
 0x136   :  { %427 = vst [vmem:[#allocation7 + $0x60] sm:$0xff] %v284_v18  ;;  %443 = vst [vmem:[#allocation7 + $0xe0] sm:$0xff] %v364_v19 }
 0x138   :  { %v568_v20 = vpop.f32.mrb[14].mxu0  ;;  %v592_v21 = vpop.f32.mrb[14].mxu1 }
 0x139   :  { %v294_v22 = vpop.f32.mrb[15].mxu0  ;;  %v374_v23 = vpop.f32.mrb[15].mxu1  ;;  %430 = vst [vmem:[#allocation7 + $0x78] sm:$0xff] %v568_v20  ;;  %446 = vst [vmem:[#allocation7 + $0xf8] sm:$0xff] %v592_v21 }
 0x13a   :  { %429 = vst [vmem:[#allocation7 + $0x70] sm:$0xff] %v294_v22  ;;  %445 = vst [vmem:[#allocation7 + $0xf0] sm:$0xff] %v374_v23 }
 0x13b   :  { %702 = shalt.err (!%p699_p6)
}
 0x13c   :  { %s703_s10 = scalar_lea.hbm %s786_s2, 4096 }
 0x13d   :  { %p704_p7 = scmp.ne.s32.totalorder %s786_s2, %s703_s10  ;;  %p707_p8 = scmp.lt.u32.totalorder %s703_s10, %s786_s2 }
 0x13f   :  { %p709_p9 = pnand %p707_p8, %p704_p7 }
 0x141   :  { %712 = shalt.err (!%p709_p9)
}
 0x142   :  { %458 = dma.vmem_to_hbm [thread:$0]  %s453_s6, 4096, %s786_s2, [#allocation4], %s720_s19, %s720_s19, %s721_s20  }
 0x143   :  { %717 = dma.done.wait [#allocation4], 4096  }
 0x144   :  { %718 = vsyncadd [#allocation4], 4294963200 }
 0x145   :  { %462 = vsyncpa [#allocation3], 1 }
 0x146   :  { %463 = vsyncpa [#allocation6], 1 }
 0x147   :  { %464 = vsyncpa [#allocation4], 1 }

</bundles_post_ra>
